<compile_context>
chip_gen: v5e
topology: v5e:2x2
jax: 0.10.0
libtpu: 0.0.40
codegen_flags: <defaults>
</compile_context>

<pallas_src>
import math
from functools import partial

import jax
import jax.numpy as jnp
from jax import lax
from jax.experimental import pallas as pl
from jax.experimental.pallas import tpu as pltpu


def _attention_kernel(x_ref, wqkv_ref, bqkv_ref, wo_ref, bo_ref,
                      out_ref, attn_ref, *, heads, dim_head, scale):
    inner = heads * dim_head
    x = x_ref[0]                                                      # (N, DIM)

    # Fused Q/K/V projection: one lane-aligned MXU matmul instead of 3 (or 3*H) tiny ones.
    qkv = jnp.dot(x, wqkv_ref[...],
                  preferred_element_type=jnp.float32) + bqkv_ref[...]  # (N, 3*inner)
    q = qkv[:, 0 * inner:1 * inner]
    k = qkv[:, 1 * inner:2 * inner]
    v = qkv[:, 2 * inner:3 * inner]

    # Per-head scores; heads is small and static, so this is a static unroll.
    dots = []
    for h in range(heads):
        sl = slice(h * dim_head, (h + 1) * dim_head)
        # q @ k^T without materializing a transpose: contract the last axes directly.
        dots.append(lax.dot_general(q[:, sl], k[:, sl], (((1,), (1,)), ((), ())),
                                    preferred_element_type=jnp.float32))   # (N, N)
    dots = jnp.stack(dots, axis=0) * scale                            # (H, N, N)

    # Numerically stable softmax, batched over all heads at once.
    m = jnp.max(dots, axis=-1, keepdims=True)
    e = jnp.exp(dots - m)
    denom = jnp.sum(e, axis=-1, keepdims=True)
    # approx=False keeps attn within 1e-5 of the f32 reference; flip to approx=True
    # (EUP slot, ~free) when a looser tolerance is acceptable.
    attn = e * pl.reciprocal(denom, approx=False)                     # (H, N, N)
    attn_ref[0] = attn                                                # single store per step

    # attn @ v per head, then ONE fused output projection across all heads.
    o_parts = [jnp.dot(attn[h], v[:, h * dim_head:(h + 1) * dim_head],
                       preferred_element_type=jnp.float32)            # (N, DH)
               for h in range(heads)]
    o_full = jnp.concatenate(o_parts, axis=1)                         # (N, inner)
    out_ref[0] = jnp.dot(o_full, wo_ref[...],
                         preferred_element_type=jnp.float32) + bo_ref[...]


def c_attention_forward(x, params, *, heads, dim_head):
    """x: (B, N, DIM) float32. params: dict of torch-layout Linear params."""
    B, N, DIM = x.shape
    H, DH = heads, dim_head
    inner = H * DH
    scale = 1.0 / math.sqrt(DH)

    # torch nn.Linear: y = x @ W.T + b, with W shape (out, in).
    # Fuse Q/K/V projection weights along the output axis -> (DIM, 3*inner).
    w_qkv = jnp.concatenate([params["wq"].T, params["wk"].T, params["wv"].T], axis=1)
    b_qkv = jnp.concatenate([params["bq"], params["bk"], params["bv"]]).reshape(1, 3 * inner)
    wo_t = params["wo"].T               # (inner, DIM)
    bo = params["bo"].reshape(1, DIM)

    kernel = partial(_attention_kernel, heads=H, dim_head=DH, scale=scale)

    # Advisory cost estimate so XLA schedules around the custom call sensibly.
    flops = B * (2 * N * DIM * (3 * inner)        # fused QKV projection
                 + H * (4 * N * N * DH)           # q.k^T and attn.v per head
                 + 2 * N * inner * DIM)           # fused output projection
    bytes_accessed = 4 * (x.size + w_qkv.size + b_qkv.size + wo_t.size + bo.size
                          + B * N * DIM + B * H * N * N)
    cost = pl.CostEstimate(flops=flops,
                           transcendentals=B * H * N * N,
                           bytes_accessed=bytes_accessed)

    out, attn = pl.pallas_call(
        kernel,
        out_shape=(
            jax.ShapeDtypeStruct((B, N, DIM), jnp.float32),
            jax.ShapeDtypeStruct((B, H, N, N), jnp.float32),
        ),
        grid_spec=pltpu.PrefetchScalarGridSpec(
            num_scalar_prefetch=0,
            grid=(B,),
            in_specs=[
                pl.BlockSpec((1, N, DIM), lambda b: (b, 0, 0)),     # x (per batch step)
                pl.BlockSpec((DIM, 3 * inner), lambda b: (0, 0)),   # fused QKV weight (resident)
                pl.BlockSpec((1, 3 * inner), lambda b: (0, 0)),     # fused QKV bias (resident)
                pl.BlockSpec((inner, DIM), lambda b: (0, 0)),       # output proj weight (resident)
                pl.BlockSpec((1, DIM), lambda b: (0, 0)),           # output proj bias (resident)
            ],
            out_specs=[
                pl.BlockSpec((1, N, DIM), lambda b: (b, 0, 0)),        # out
                pl.BlockSpec((1, H, N, N), lambda b: (b, 0, 0, 0)),    # attn
            ],
        ),
        compiler_params=pltpu.CompilerParams(
            dimension_semantics=("parallel",),   # >= 2 steps -> both v7x TensorCores busy
        ),
        cost_estimate=cost,
    )(x, w_qkv, b_qkv, wo_t, bo)
    return out, attn


def _reference(x, params, *, heads, dim_head):
    """Pure-JAX reference of the torch forward (eval mode)."""
    B, N, DIM = x.shape
    H, DH = heads, dim_head
    q = x @ params["wq"].T + params["bq"]
    k = x @ params["wk"].T + params["bk"]
    v = x @ params["wv"].T + params["bv"]

    def split(t):  # b n (h d) -> b h n d
        return jnp.transpose(t.reshape(B, N, H, DH), (0, 2, 1, 3))

    q, k, v = split(q), split(k), split(v)
    dots = jnp.einsum("bhid,bhjd->bhij", q, k) / math.sqrt(DH)
    attn = jax.nn.softmax(dots, axis=-1)
    o = jnp.einsum("bhij,bhjd->bhid", attn, v)
    o = jnp.transpose(o, (0, 2, 1, 3)).reshape(B, N, H * DH)
    out = o @ params["wo"].T + params["bo"]
    return out, attn


if __name__ == "__main__":
    # Small shapes consistent with the module's forward.
    B, N, DIM = 2, 8, 32
    HEADS, DIM_HEAD = 4, 16
    INNER = HEADS * DIM_HEAD

    key = jax.random.PRNGKey(0)
    keys = jax.random.split(key, 10)

    x = jax.random.normal(keys[0], (B, N, DIM), dtype=jnp.float32)

    # Deterministic parameter init (torch Linear layout: W (out, in), b (out,)).
    s = 0.05
    params = {
        "wq": s * jax.random.normal(keys[1], (INNER, DIM), dtype=jnp.float32),
        "bq": s * jax.random.normal(keys[2], (INNER,), dtype=jnp.float32),
        "wk": s * jax.random.normal(keys[3], (INNER, DIM), dtype=jnp.float32),
        "bk": s * jax.random.normal(keys[4], (INNER,), dtype=jnp.float32),
        "wv": s * jax.random.normal(keys[5], (INNER, DIM), dtype=jnp.float32),
        "bv": s * jax.random.normal(keys[6], (INNER,), dtype=jnp.float32),
        "wo": s * jax.random.normal(keys[7], (DIM, INNER), dtype=jnp.float32),
        "bo": s * jax.random.normal(keys[8], (DIM,), dtype=jnp.float32),
    }

    out, attn = c_attention_forward(x, params, heads=HEADS, dim_head=DIM_HEAD)
    out, attn = jax.block_until_ready(out), jax.block_until_ready(attn)

    ref_out, ref_attn = _reference(x, params, heads=HEADS, dim_head=DIM_HEAD)
    assert out.shape == (B, N, DIM) and attn.shape == (B, HEADS, N, N)
    assert jnp.allclose(out, ref_out, atol=1e-5, rtol=1e-5)
    assert jnp.allclose(attn, ref_attn, atol=1e-5, rtol=1e-5)

    print("KERNEL_OK")
</pallas_src>

<mosaic_0001>
module attributes {stable_mosaic.version = 11 : i64} {
  func.func @_attention_kernel(%arg0: i32, %arg1: memref<1x8x32xf32, #tpu.memory_space<vmem>>, %arg2: memref<32x192xf32, #tpu.memory_space<vmem>>, %arg3: memref<1x192xf32, #tpu.memory_space<vmem>>, %arg4: memref<64x32xf32, #tpu.memory_space<vmem>>, %arg5: memref<1x32xf32, #tpu.memory_space<vmem>>, %arg6: memref<1x8x32xf32, #tpu.memory_space<vmem>>, %arg7: memref<1x4x8x8xf32, #tpu.memory_space<vmem>>) attributes {dimension_semantics = [#tpu.dimension_semantics<parallel>], iteration_bounds = array<i64: 2>, scalar_prefetch = 0 : i64, scratch_operands = 0 : i64, tpu.core_type = #tpu.core_type<tc>, window_params = [{transform_indices = @transform_0, window_bounds = array<i64: 1, 8, 32>}, {pipeline_mode = #tpu.pipeline_mode<synchronous>, transform_indices = @transform_1, window_bounds = array<i64: 32, 192>}, {pipeline_mode = #tpu.pipeline_mode<synchronous>, transform_indices = @transform_2, window_bounds = array<i64: 1, 192>}, {pipeline_mode = #tpu.pipeline_mode<synchronous>, transform_indices = @transform_3, window_bounds = array<i64: 64, 32>}, {pipeline_mode = #tpu.pipeline_mode<synchronous>, transform_indices = @transform_4, window_bounds = array<i64: 1, 32>}, {transform_indices = @transform_5, window_bounds = array<i64: 1, 8, 32>}, {transform_indices = @transform_6, window_bounds = array<i64: 1, 4, 8, 8>}]} {
    %c0 = arith.constant 0 : index
    %c0_0 = arith.constant 0 : index
    %c0_1 = arith.constant 0 : index
    %0 = vector.load %arg1[%c0, %c0_0, %c0_1] : memref<1x8x32xf32, #tpu.memory_space<vmem>>, vector<1x8x32xf32>
    %1 = vector.shape_cast %0 : vector<1x8x32xf32> to vector<8x32xf32>
    %c0_2 = arith.constant 0 : index
    %c0_3 = arith.constant 0 : index
    %2 = vector.load %arg2[%c0_2, %c0_3] : memref<32x192xf32, #tpu.memory_space<vmem>>, vector<32x192xf32>
    %cst = arith.constant dense<0.000000e+00> : vector<8x192xf32>
    %3 = tpu.matmul %1, %2, %cst {dimension_numbers = #tpu.dot_dimension_numbers<[1], [0], [0], [1], [0, 0, 1, 1], [], []>} : vector<8x32xf32>, vector<32x192xf32>, vector<8x192xf32> -> vector<8x192xf32>
    %c0_4 = arith.constant 0 : index
    %c0_5 = arith.constant 0 : index
    %4 = vector.load %arg3[%c0_4, %c0_5] : memref<1x192xf32, #tpu.memory_space<vmem>>, vector<1x192xf32>
    %5 = vector.broadcast %4 : vector<1x192xf32> to vector<8x192xf32>
    %6 = arith.addf %3, %5 : vector<8x192xf32>
    %7 = vector.extract_strided_slice %6 {offsets = [0, 0], sizes = [8, 64], strides = [1, 1]} : vector<8x192xf32> to vector<8x64xf32>
    %8 = vector.extract_strided_slice %6 {offsets = [0, 64], sizes = [8, 64], strides = [1, 1]} : vector<8x192xf32> to vector<8x64xf32>
    %9 = vector.extract_strided_slice %6 {offsets = [0, 128], sizes = [8, 64], strides = [1, 1]} : vector<8x192xf32> to vector<8x64xf32>
    %10 = vector.extract_strided_slice %7 {offsets = [0, 0], sizes = [8, 16], strides = [1, 1]} : vector<8x64xf32> to vector<8x16xf32>
    %11 = vector.extract_strided_slice %8 {offsets = [0, 0], sizes = [8, 16], strides = [1, 1]} : vector<8x64xf32> to vector<8x16xf32>
    %cst_6 = arith.constant dense<0.000000e+00> : vector<8x8xf32>
    %12 = tpu.matmul %10, %11, %cst_6 {dimension_numbers = #tpu.dot_dimension_numbers<[1], [1], [0], [0], [0, 0, 1, 0], [], []>} : vector<8x16xf32>, vector<8x16xf32>, vector<8x8xf32> -> vector<8x8xf32>
    %13 = vector.extract_strided_slice %7 {offsets = [0, 16], sizes = [8, 16], strides = [1, 1]} : vector<8x64xf32> to vector<8x16xf32>
    %14 = vector.extract_strided_slice %8 {offsets = [0, 16], sizes = [8, 16], strides = [1, 1]} : vector<8x64xf32> to vector<8x16xf32>
    %cst_7 = arith.constant dense<0.000000e+00> : vector<8x8xf32>
    %15 = tpu.matmul %13, %14, %cst_7 {dimension_numbers = #tpu.dot_dimension_numbers<[1], [1], [0], [0], [0, 0, 1, 0], [], []>} : vector<8x16xf32>, vector<8x16xf32>, vector<8x8xf32> -> vector<8x8xf32>
    %16 = vector.extract_strided_slice %7 {offsets = [0, 32], sizes = [8, 16], strides = [1, 1]} : vector<8x64xf32> to vector<8x16xf32>
    %17 = vector.extract_strided_slice %8 {offsets = [0, 32], sizes = [8, 16], strides = [1, 1]} : vector<8x64xf32> to vector<8x16xf32>
    %cst_8 = arith.constant dense<0.000000e+00> : vector<8x8xf32>
    %18 = tpu.matmul %16, %17, %cst_8 {dimension_numbers = #tpu.dot_dimension_numbers<[1], [1], [0], [0], [0, 0, 1, 0], [], []>} : vector<8x16xf32>, vector<8x16xf32>, vector<8x8xf32> -> vector<8x8xf32>
    %19 = vector.extract_strided_slice %7 {offsets = [0, 48], sizes = [8, 16], strides = [1, 1]} : vector<8x64xf32> to vector<8x16xf32>
    %20 = vector.extract_strided_slice %8 {offsets = [0, 48], sizes = [8, 16], strides = [1, 1]} : vector<8x64xf32> to vector<8x16xf32>
    %cst_9 = arith.constant dense<0.000000e+00> : vector<8x8xf32>
    %21 = tpu.matmul %19, %20, %cst_9 {dimension_numbers = #tpu.dot_dimension_numbers<[1], [1], [0], [0], [0, 0, 1, 0], [], []>} : vector<8x16xf32>, vector<8x16xf32>, vector<8x8xf32> -> vector<8x8xf32>
    %22 = vector.shape_cast %12 : vector<8x8xf32> to vector<1x8x8xf32>
    %23 = vector.shape_cast %15 : vector<8x8xf32> to vector<1x8x8xf32>
    %24 = vector.shape_cast %18 : vector<8x8xf32> to vector<1x8x8xf32>
    %25 = vector.shape_cast %21 : vector<8x8xf32> to vector<1x8x8xf32>
    %26 = tpu.concatenate %22, %23, %24, %25 in 0 : vector<1x8x8xf32>, vector<1x8x8xf32>, vector<1x8x8xf32>, vector<1x8x8xf32> -> vector<4x8x8xf32>
    %cst_10 = arith.constant 2.500000e-01 : f32
    %27 = vector.broadcast %cst_10 : f32 to vector<4x8x8xf32>
    %28 = arith.mulf %26, %27 : vector<4x8x8xf32>
    %cst_11 = arith.constant dense<0xFF800000> : vector<4x8xf32>
    %29 = vector.multi_reduction <maximumf>, %28, %cst_11 [2] : vector<4x8x8xf32> to vector<4x8xf32>
    %30 = vector.shape_cast %29 : vector<4x8xf32> to vector<4x8x1xf32>
    %31 = vector.broadcast %30 : vector<4x8x1xf32> to vector<4x8x8xf32>
    %32 = arith.subf %28, %31 : vector<4x8x8xf32>
    %33 = math.exp %32 : vector<4x8x8xf32>
    %cst_12 = arith.constant dense<0.000000e+00> : vector<4x8xf32>
    %34 = vector.multi_reduction <add>, %33, %cst_12 [2] : vector<4x8x8xf32> to vector<4x8xf32>
    %35 = vector.shape_cast %34 : vector<4x8xf32> to vector<4x8x1xf32>
    %36 = tpu.reciprocal %35 : vector<4x8x1xf32> -> vector<4x8x1xf32>
    %37 = vector.broadcast %36 : vector<4x8x1xf32> to vector<4x8x8xf32>
    %38 = arith.mulf %33, %37 : vector<4x8x8xf32>
    %c0_13 = arith.constant 0 : index
    %c0_14 = arith.constant 0 : index
    %c0_15 = arith.constant 0 : index
    %c0_16 = arith.constant 0 : index
    %39 = vector.load %arg7[%c0_13, %c0_14, %c0_15, %c0_16] : memref<1x4x8x8xf32, #tpu.memory_space<vmem>>, vector<1x4x8x8xf32>
    %40 = vector.shape_cast %39 : vector<1x4x8x8xf32> to vector<4x8x8xf32>
    %41 = vector.shape_cast %38 : vector<4x8x8xf32> to vector<1x4x8x8xf32>
    tpu.vector_store %arg7[%c0_13, %c0_14, %c0_15, %c0_16], %41 {strides = array<i32>} : memref<1x4x8x8xf32, #tpu.memory_space<vmem>>, vector<1x4x8x8xf32>,
    %42 = vector.extract_strided_slice %38 {offsets = [0, 0, 0], sizes = [1, 8, 8], strides = [1, 1, 1]} : vector<4x8x8xf32> to vector<1x8x8xf32>
    %43 = vector.shape_cast %42 : vector<1x8x8xf32> to vector<8x8xf32>
    %44 = vector.extract_strided_slice %9 {offsets = [0, 0], sizes = [8, 16], strides = [1, 1]} : vector<8x64xf32> to vector<8x16xf32>
    %cst_17 = arith.constant dense<0.000000e+00> : vector<8x16xf32>
    %45 = tpu.matmul %43, %44, %cst_17 {dimension_numbers = #tpu.dot_dimension_numbers<[1], [0], [0], [1], [0, 0, 1, 1], [], []>} : vector<8x8xf32>, vector<8x16xf32>, vector<8x16xf32> -> vector<8x16xf32>
    %46 = vector.extract_strided_slice %38 {offsets = [1, 0, 0], sizes = [1, 8, 8], strides = [1, 1, 1]} : vector<4x8x8xf32> to vector<1x8x8xf32>
    %47 = vector.shape_cast %46 : vector<1x8x8xf32> to vector<8x8xf32>
    %48 = vector.extract_strided_slice %9 {offsets = [0, 16], sizes = [8, 16], strides = [1, 1]} : vector<8x64xf32> to vector<8x16xf32>
    %cst_18 = arith.constant dense<0.000000e+00> : vector<8x16xf32>
    %49 = tpu.matmul %47, %48, %cst_18 {dimension_numbers = #tpu.dot_dimension_numbers<[1], [0], [0], [1], [0, 0, 1, 1], [], []>} : vector<8x8xf32>, vector<8x16xf32>, vector<8x16xf32> -> vector<8x16xf32>
    %50 = vector.extract_strided_slice %38 {offsets = [2, 0, 0], sizes = [1, 8, 8], strides = [1, 1, 1]} : vector<4x8x8xf32> to vector<1x8x8xf32>
    %51 = vector.shape_cast %50 : vector<1x8x8xf32> to vector<8x8xf32>
    %52 = vector.extract_strided_slice %9 {offsets = [0, 32], sizes = [8, 16], strides = [1, 1]} : vector<8x64xf32> to vector<8x16xf32>
    %cst_19 = arith.constant dense<0.000000e+00> : vector<8x16xf32>
    %53 = tpu.matmul %51, %52, %cst_19 {dimension_numbers = #tpu.dot_dimension_numbers<[1], [0], [0], [1], [0, 0, 1, 1], [], []>} : vector<8x8xf32>, vector<8x16xf32>, vector<8x16xf32> -> vector<8x16xf32>
    %54 = vector.extract_strided_slice %38 {offsets = [3, 0, 0], sizes = [1, 8, 8], strides = [1, 1, 1]} : vector<4x8x8xf32> to vector<1x8x8xf32>
    %55 = vector.shape_cast %54 : vector<1x8x8xf32> to vector<8x8xf32>
    %56 = vector.extract_strided_slice %9 {offsets = [0, 48], sizes = [8, 16], strides = [1, 1]} : vector<8x64xf32> to vector<8x16xf32>
    %cst_20 = arith.constant dense<0.000000e+00> : vector<8x16xf32>
    %57 = tpu.matmul %55, %56, %cst_20 {dimension_numbers = #tpu.dot_dimension_numbers<[1], [0], [0], [1], [0, 0, 1, 1], [], []>} : vector<8x8xf32>, vector<8x16xf32>, vector<8x16xf32> -> vector<8x16xf32>
    %58 = tpu.concatenate %45, %49, %53, %57 in 1 : vector<8x16xf32>, vector<8x16xf32>, vector<8x16xf32>, vector<8x16xf32> -> vector<8x64xf32>
    %c0_21 = arith.constant 0 : index
    %c0_22 = arith.constant 0 : index
    %59 = vector.load %arg4[%c0_21, %c0_22] : memref<64x32xf32, #tpu.memory_space<vmem>>, vector<64x32xf32>
    %cst_23 = arith.constant dense<0.000000e+00> : vector<8x32xf32>
    %60 = tpu.matmul %58, %59, %cst_23 {dimension_numbers = #tpu.dot_dimension_numbers<[1], [0], [0], [1], [0, 0, 1, 1], [], []>} : vector<8x64xf32>, vector<64x32xf32>, vector<8x32xf32> -> vector<8x32xf32>
    %c0_24 = arith.constant 0 : index
    %c0_25 = arith.constant 0 : index
    %61 = vector.load %arg5[%c0_24, %c0_25] : memref<1x32xf32, #tpu.memory_space<vmem>>, vector<1x32xf32>
    %62 = vector.broadcast %61 : vector<1x32xf32> to vector<8x32xf32>
    %63 = arith.addf %60, %62 : vector<8x32xf32>
    %c0_26 = arith.constant 0 : index
    %c0_27 = arith.constant 0 : index
    %c0_28 = arith.constant 0 : index
    %64 = vector.load %arg6[%c0_26, %c0_27, %c0_28] : memref<1x8x32xf32, #tpu.memory_space<vmem>>, vector<1x8x32xf32>
    %65 = vector.shape_cast %64 : vector<1x8x32xf32> to vector<8x32xf32>
    %66 = vector.shape_cast %63 : vector<8x32xf32> to vector<1x8x32xf32>
    tpu.vector_store %arg6[%c0_26, %c0_27, %c0_28], %66 {strides = array<i32>} : memref<1x8x32xf32, #tpu.memory_space<vmem>>, vector<1x8x32xf32>,
    return
  }
  func.func @transform_0(%arg0: i32) -> (i32, i32, i32) {
    %c0_i32 = arith.constant 0 : i32
    %c0_i32_0 = arith.constant 0 : i32
    %c0_i32_1 = arith.constant 0 : i32
    return %arg0, %c0_i32, %c0_i32_0 : i32, i32, i32
  }
  func.func @transform_1(%arg0: i32) -> (i32, i32) {
    %c0_i32 = arith.constant 0 : i32
    %c0_i32_0 = arith.constant 0 : i32
    %c0_i32_1 = arith.constant 0 : i32
    return %c0_i32, %c0_i32_0 : i32, i32
  }
  func.func @transform_2(%arg0: i32) -> (i32, i32) {
    %c0_i32 = arith.constant 0 : i32
    %c0_i32_0 = arith.constant 0 : i32
    %c0_i32_1 = arith.constant 0 : i32
    return %c0_i32, %c0_i32_0 : i32, i32
  }
  func.func @transform_3(%arg0: i32) -> (i32, i32) {
    %c0_i32 = arith.constant 0 : i32
    %c0_i32_0 = arith.constant 0 : i32
    %c0_i32_1 = arith.constant 0 : i32
    return %c0_i32, %c0_i32_0 : i32, i32
  }
  func.func @transform_4(%arg0: i32) -> (i32, i32) {
    %c0_i32 = arith.constant 0 : i32
    %c0_i32_0 = arith.constant 0 : i32
    %c0_i32_1 = arith.constant 0 : i32
    return %c0_i32, %c0_i32_0 : i32, i32
  }
  func.func @transform_5(%arg0: i32) -> (i32, i32, i32) {
    %c0_i32 = arith.constant 0 : i32
    %c0_i32_0 = arith.constant 0 : i32
    %c0_i32_1 = arith.constant 0 : i32
    return %arg0, %c0_i32, %c0_i32_0 : i32, i32, i32
  }
  func.func @transform_6(%arg0: i32) -> (i32, i32, i32, i32) {
    %c0_i32 = arith.constant 0 : i32
    %c0_i32_0 = arith.constant 0 : i32
    %c0_i32_1 = arith.constant 0 : i32
    %c0_i32_2 = arith.constant 0 : i32
    return %arg0, %c0_i32, %c0_i32_0, %c0_i32_1 : i32, i32, i32, i32
  }
}

</mosaic_0001>

<bundles_post_ra>
// kernel: tpu_custom_call.1
= control target key start
LH: loop header
LB: loop body
LE: loop exit
PB: predicated region body
PF: predicated region fallthrough
CT: control target
= control target key end

     0   :  { %s1278_s0 = inlined_call_operand.vmem [shape: f32[2,8,32], index: 0, kind: input, shape index: {}]   ;;  %s1279_s1 = inlined_call_operand.vmem [shape: f32[32,192], index: 1, kind: input, shape index: {}]   ;;  %s1280_s2 = inlined_call_operand.vmem [shape: f32[1,192], index: 2, kind: input, shape index: {}]   ;;  %s1281_s3 = inlined_call_operand.vmem [shape: f32[64,32], index: 3, kind: input, shape index: {}]   ;;  %s1282_s4 = inlined_call_operand.vmem [shape: f32[1,32], index: 4, kind: input, shape index: {}]   ;;  %s1283_s5 = inlined_call_operand.hbm [shape: f32[2,8,32], index: 5, kind: output, shape index: {0}]   ;;  %s1284_s6 = inlined_call_operand.hbm [shape: f32[2,4,8,8], index: 6, kind: output, shape index: {1}]  }
   0x1   :  { %1285 = sst [smem:[#allocation8_spill]] %s1278_s0 }
   0x2   :  { %12 = vsyncpa [#allocation3], 0 }
   0x3   :  { %14 = vsyncpa [#allocation3 + $0x1], 0 }
   0x4   :  { %15 = vsyncpa [#allocation5], 0 }
   0x5   :  { %17 = vsyncpa [#allocation5 + $0x1], 0  ;;  %s1059_s21 = smov 0   ;;  %s1061_s22 = smov 0  }
   0x6   :  { %s1063_s23 = smov 0   ;;  %s1065_s24 = smov 0  }
   0x7 LB: > { %s1080_s25 = sadd.s32 4294967295, %s1013_s24   ;;  %s819_s26 = sadd.s32 4294967294, %s1013_s24   ;;  %s1013_s24 = sphi %s1065_s24, %s1292_s24   ;;  %s1009_s23 = sphi %s1063_s23, %s1291_s23   ;;  %s1005_s22 = sphi %s1061_s22, %s1290_s22   ;;  %s1001_s21 = sphi %s1059_s21, %s1289_s21  }
   0x8   : > { %s1084_s27 = sadd.s32 1, %s1013_s24   ;;  %s140_s28 = sadd.s32 1, %s1009_s23 }
   0x9   : > { %s137_s29 = ssub.s32 %s1013_s24, %s1084_s27  ;;  %p150_p0 = scmp.ne.s32.totalorder %s1009_s23, %s1005_s22 }
   0xa   : > { %p138_p1 = scmp.eq.s32.totalorder %s137_s29, 0  ;;  %p151_p2 = scmp.eq.s32.totalorder %s1080_s25, 1 }
   0xb   : > { %p156_p3 = scmp.ne.s32.totalorder %s1005_s22, %s1001_s21  ;;  %p157_p4 = scmp.eq.s32.totalorder %s819_s26, 1 }
   0xc   : > { %s1095_s30 = scalar_select %p138_p1, %s1009_s23, %s140_s28  }
   0xd   : > { %p1097_p5 = por %p151_p2, %p150_p0  ;;  %p1101_p6 = por %p157_p4, %p156_p3 }
   0xe   : > { %p822_p7 = scmp.ge.s32.totalorder %s1013_s24, 1  ;;  %p220_p8 = scmp.lt.s32.totalorder %s1013_s24, 3 }
  0x10   : > { %p221_p9 = pnand %p822_p7, %p220_p8 }
  0x11   : > { %p254_p10 = scmp.lt.s32.totalorder (!%p221_p9), %s1080_s25, 1  ;;  %s1288_s0 = sld [smem:[#allocation8_spill]] (!%p221_p9) }
  0x12   : > { %224 = sbr.rel (%p221_p9) target bundleno = 1071 (0x42f), region = 40  ;;  %s1015_s9 = smov (!%p221_p9), 16  }
  0x13   : > { %s1016_s10 = smov (!%p221_p9), 112   ;;  %s1017_s11 = smov (!%p221_p9), 64  }
  0x14   : > { %s1018_s12 = smov (!%p221_p9), 96   ;;  %s1019_s13 = smov (!%p221_p9), 32  }
  0x15   : > { %s1020_s14 = smov (!%p221_p9), 48   ;;  %s848_s19 = sshll.u32 (!%p221_p9), %s1080_s25, 5 }
  0x17   : > { %v265_v0 = vld [vmem:[%s1279_s1 + $0x30] sm:$0xff]  ;;  %v263_v1 = vld [vmem:[%s1279_s1 + $0x20] sm:$0xff]  ;;  %s255_s15 = scalar_select %p254_p10, %s1080_s25, 1  ;;  %vm273_vm0 = vcmask 261120   ;;  %vm320_vm1 = vcmask 130048   ;;  %v266_v16 = vld [vmem:[%s1279_s1 + $0x38] sm:$0xff] }
  0x18   : > { %289 = vmatpush.msra.mxu1 %v265_v0  ;;  %v261_v2 = vld [vmem:[%s1279_s1 + $0x10] sm:$0xff]  ;;  %v259_v3 = vld [vmem:[%s1279_s1] sm:$0xff]  ;;  %v264_v17 = vld [vmem:[%s1279_s1 + $0x28] sm:$0xff]  ;;  %vm433_vm2 = vcmask 64512  }
  0x19   : > { %s825_s18 = sshll.u32 %s255_s15, 3  ;;  %v1128_v5 = vld [vmem:[%s1280_s2] sm:$0x3]  ;;  %s1021_s15 = smov 80   ;;  %v262_v18 = vld [vmem:[%s1279_s1 + $0x18] sm:$0xff]  ;;  %v260_v19 = vld [vmem:[%s1279_s1 + $0x8] sm:$0xff] }
  0x1a   : > { %290 = vmatpush.msra.mxu1 %v263_v1  ;;  %s257_s26 = scalar_lea.vmem %s1288_s0, %s825_s18  ;;  %v269_v6 = vperm.slane %v1128_v5, 0  ;;  %v270_v32 = vperm.slane %v1128_v5, 1 }
  0x1b   : > { %v258_v4 = vld [vmem:[%s257_s26] sm:$0xff]  ;;  %s720_s26 = scalar_lea.hbm %s1284_s6, %s848_s19 }
  0x1c   : > { %291 = vmatpush.msra.mxu1 %v261_v2 }
  0x1e   : > { %292 = vmatpush.msra.mxu1 %v259_v3 }
  0x1f   : > { %826 = vmatmul.msk.f32.vlgmr.msra.gmra.mxu1 %vm273_vm0, %v258_v4 }
  0x20   : > { %309 = vmatpush.msrb.mxu1 %v266_v16 }
  0x22   : > { %310 = vmatpush.msrb.mxu1 %v264_v17 }
  0x24   : > { %311 = vmatpush.msrb.mxu1 %v262_v18 }
  0x26   : > { %312 = vmatpush.msrb.mxu1 %v260_v19 }
  0x27   : > { %827 = vmatmul.msk.f32.vlgmr.msrb.gmra.mxu1 %vm273_vm0, %v258_v4 }
  0x9c   : > { %v294_v7 = vpop.f32.mrf.mxu1 }
  0x9d   : > { %v295_v8 = vadd.f32 %v294_v7, %v269_v6 }
  0x9f   : > { %403 = vrot.lane.b32.xlu2 %v295_v8, %s1015_s9  ;;  %345 = vrot.lane.b32.xlu1 %v295_v8, %s1016_s10 }
  0xa0   : > { %318 = vrot.lane.b32.xlu0 %v295_v8, %s1017_s11 }
  0xa4   : > { %v314_v33 = vpop.f32.mrf.mxu1 }
  0xa5   : > { %v315_v34 = vadd.f32 %v314_v33, %v270_v32 }
  0xa7   : > { %373 = vrot.lane.b32.xlu2 %v295_v8, %s1018_s12  ;;  %375 = vrot.lane.b32.xlu1 %v295_v8, %s1019_s13 }
  0xa8   : > { %347 = vrot.lane.b32.xlu0 %v295_v8, %s1020_s14  ;;  %552 = vmatpush.msra.mxu0 %v315_v34 }
  0xb0   : > { %401 = vrot.lane.b32.xlu0 %v295_v8, %s1021_s15 }
  0xf9   : > { %v404_v11 = vpop.permute.xlu2 %403 }
 0x101   : > { %v374_v14 = vpop.permute.xlu2 %373 }
 0x111   : > { %v346_v9 = vpop.permute.xlu1 %345 }
 0x112   : > { %v319_v10 = vpop.permute.xlu0 %318 }
 0x113   : > { %828 = vmatpush.xpose.msk.msra.mxu2 %vm320_vm1, %v319_v10 }
 0x116   : > { %829 = vmatmul.msk.f32.vlgmr.msra.gmra.mxu2 %vm320_vm1, %v295_v8 }
 0x119   : > { %v376_v12 = vpop.permute.xlu1 %375 }
 0x11a   : > { %v348_v13 = vpop.permute.xlu0 %347  ;;  %832 = vmatpush.xpose.msk.msrb.mxu2 %vm320_vm1, %v376_v12 }
 0x11b   : > { %830 = vmatpush.xpose.msk.msra.mxu3 %vm320_vm1, %v348_v13 }
 0x11e   : > { %831 = vmatmul.msk.f32.vlgmr.msra.gmra.mxu3 %vm320_vm1, %v346_v9  ;;  %833 = vmatmul.msk.f32.vlgmr.msrb.gmra.mxu2 %vm320_vm1, %v374_v14 }
 0x11f   : > { %834 = vmatpush.xpose.msk.msrb.mxu3 %vm320_vm1, %v404_v11 }
 0x122   : > { %v402_v15 = vpop.permute.xlu0 %401 }
 0x126   : > { %835 = vmatmul.msk.f32.vlgmr.msrb.gmra.mxu3 %vm320_vm1, %v402_v15 }
 0x199   : > { %v342_v20 = vpop.f32.mrf.mxu2 }
 0x19a   : > { %v429_v30 = vmul.f32 0.25, %v342_v20 }
 0x19c   : > { %v434_v31 = vsel %vm433_vm2, %v429_v30, -inf }
 0x1a1   : > { %v370_v21 = vpop.f32.mrf.mxu3  ;;  %v398_v22 = vpop.f32.mrf.mxu2 }
 0x1a2   : > { %v430_v23 = vmul.f32 0.25, %v370_v21  ;;  %v431_v24 = vmul.f32 0.25, %v398_v22 }
 0x1a4   : > { %v440_v25 = vsel %vm433_vm2, %v431_v24, -inf  ;;  %v437_v26 = vsel %vm433_vm2, %v430_v23, -inf }
 0x1a5   : > { %441 = vmax.xlane.f32.xlu1 %v440_v25  ;;  %438 = vmax.xlane.f32.xlu0 %v437_v26 }
 0x1a9   : > { %v426_v27 = vpop.f32.mrf.mxu3 }
 0x1aa   : > { %v432_v28 = vmul.f32 0.25, %v426_v27 }
 0x1ac   : > { %v443_v29 = vsel %vm433_vm2, %v432_v28, -inf }
 0x1ad   : > { %444 = vmax.xlane.f32.xlu2 %v443_v29 }
 0x1b5   : > { %435 = vmax.xlane.f32.xlu2 %v434_v31 }
 0x218   : > { %v442_v35 = vpop.xlane.xlu1 %441  ;;  %v439_v36 = vpop.xlane.xlu0 %438 }
 0x219   : > { %v448_v37 = vsub.f32 %v431_v24, %v442_v35  ;;  %v447_v38 = vsub.f32 %v430_v23, %v439_v36 }
 0x21b   : > { %v454_v39 = vmul.f32 1.442695, %v448_v37  ;;  %v452_v40 = vmul.f32 1.442695, %v447_v38 }
 0x21d   : > { %903 = vpow2.f32 %v454_v39 }
 0x21e   : > { %905 = vpow2.f32 %v452_v40 }
 0x220   : > { %v445_v41 = vpop.xlane.xlu2 %444 }
 0x221   : > { %v449_v42 = vsub.f32 %v432_v28, %v445_v41 }
 0x223   : > { %v904_v43 = vpop.eup %903  ;;  %v456_v44 = vmul.f32 1.442695, %v449_v42 }
 0x224   : > { %v906_v45 = vpop.eup %905  ;;  %v464_v46 = vsel %vm433_vm2, %v904_v43, 0.0 }
 0x225   : > { %907 = vpow2.f32 %v456_v44  ;;  %465 = vadd.xlane.f32.xlu1 %v464_v46  ;;  %v461_v47 = vsel %vm433_vm2, %v906_v45, 0.0  ;;  %v658_v46 = vld [vmem:[%s1281_s3 + $0x30] sm:$0xff] }
 0x226   : > { %462 = vadd.xlane.f32.xlu0 %v461_v47  ;;  %v657_v47 = vld [vmem:[%s1281_s3 + $0x28] sm:$0xff] }
 0x228   : > { %v436_v50 = vpop.xlane.xlu2 %435 }
 0x229   : > { %v446_v51 = vsub.f32 %v429_v30, %v436_v50  ;;  %v654_v50 = vld [vmem:[%s1281_s3 + $0x10] sm:$0xff] }
 0x22b   : > { %v1165_v48 = vpop.eup %907  ;;  %v450_v52 = vmul.f32 1.442695, %v446_v51  ;;  %v653_v51 = vld [vmem:[%s1281_s3 + $0x8] sm:$0xff] }
 0x22c   : > { %v467_v49 = vsel %vm433_vm2, %v1165_v48, 0.0 }
 0x22d   : > { %468 = vadd.xlane.f32.xlu2 %v467_v49  ;;  %909 = vpow2.f32 %v450_v52  ;;  %v655_v49 = vld [vmem:[%s1281_s3 + $0x18] sm:$0xff]  ;;  %v652_v52 = vld [vmem:[%s1281_s3] sm:$0xff] }
 0x233   : > { %v1172_v53 = vpop.eup %909 }
 0x234   : > { %v458_v54 = vsel %vm433_vm2, %v1172_v53, 0.0 }
 0x23a   : > { %558 = vrot.lane.b32.xlu0 %v315_v34, %s1016_s10  ;;  %s1177_s10 = sand.u32 1, %s1005_s22  }
 0x23b   : > { %s824_s11 = sshll.u32 %s1177_s10, 5 }
 0x23e   : > { %584 = vrot.lane.b32.xlu1 %v315_v34, %s1018_s12  ;;  %s1180_s12 = scalar_lea.vmem [#allocation4], %s824_s11 }
 0x23f   : > { %s721_s18 = sshll.u32 %s1180_s12, 4  ;;  %s722_s18 = int_to_ptr.vmem [resolvable:$true] %s721_s18 }
 0x245   : > { %610 = vrot.lane.b32.xlu2 %v315_v34, %s1021_s15 }
 0x268   : > { %459 = vadd.xlane.f32.xlu1 %v458_v54 }
 0x298   : > { %v466_v55 = vpop.xlane.xlu1 %465 }
 0x299   : > { %911 = vrcp.f32 %v466_v55  ;;  %v463_v56 = vpop.xlane.xlu0 %462  ;;  %v509_v63 = vand.u32 2147483648, %v466_v55  ;;  %v507_v2 = vand.u32 2147483647, %v466_v55  ;;  %vm503_vm5 = vweird.f32 %v466_v55 }
 0x29a   : > { %913 = vrcp.f32 %v463_v56  ;;  %v495_v3 = vand.u32 2147483648, %v463_v56  ;;  %v493_v5 = vand.u32 2147483647, %v463_v56  ;;  %vm489_vm7 = vweird.f32 %v463_v56 }
 0x29b   : > { %v510_v8 = vor.u32 1.1754944e-38, %v509_v63  ;;  %vm508_vm8 = vcmp.eq.f32.partialorder %v507_v2, 8.507059e+37 }
 0x29c   : > { %v496_v11 = vor.u32 1.1754944e-38, %v495_v3  ;;  %vm494_vm10 = vcmp.eq.f32.partialorder %v493_v5, 8.507059e+37 }
 0x29f   : > { %v912_v57 = vpop.eup %911 }
 0x2a0   : > { %v914_v58 = vpop.eup %913  ;;  %v499_v59 = vmul.f32 %v912_v57, %v466_v55  ;;  %v469_v60 = vpop.xlane.xlu2 %468  ;;  %vm504_vm3 = vweird.f32 %v912_v57 }
 0x2a1   : > { %v485_v61 = vmul.f32 %v914_v58, %v463_v56  ;;  %915 = vrcp.f32 %v469_v60  ;;  %vm490_vm4 = vweird.f32 %v914_v58  ;;  %vm505_vm6 = vmor %vm503_vm5, %vm504_vm3  ;;  %v523_v19 = vand.u32 2147483648, %v469_v60 }
 0x2a2   : > { %v500_v62 = vsub.f32 1.0, %v499_v59  ;;  %vm491_vm9 = vmor %vm489_vm7, %vm490_vm4  ;;  %v521_v22 = vand.u32 2147483647, %v469_v60  ;;  %vm517_vm12 = vweird.f32 %v469_v60 }
 0x2a3   : > { %v486_v0 = vsub.f32 1.0, %v485_v61  ;;  %v524_v25 = vor.u32 1.1754944e-38, %v523_v19 }
 0x2a4   : > { %v501_v1 = vmul.f32 %v912_v57, %v500_v62  ;;  %vm522_vm14 = vcmp.eq.f32.partialorder %v521_v22, 8.507059e+37 }
 0x2a5   : > { %v487_v4 = vmul.f32 %v914_v58, %v486_v0 }
 0x2a6   : > { %v502_v6 = vadd.f32 %v912_v57, %v501_v1 }
 0x2a7   : > { %v916_v7 = vpop.eup %915  ;;  %v488_v9 = vadd.f32 %v914_v58, %v487_v4 }
 0x2a8   : > { %v506_v10 = vsel %vm505_vm6, %v912_v57, %v502_v6  ;;  %v513_v12 = vmul.f32 %v916_v7, %v469_v60  ;;  %v611_v13 = vpop.permute.xlu2 %610  ;;  %vm518_vm11 = vweird.f32 %v916_v7  ;;  %vm664_vm6 = vcmask 523264  }
 0x2a9   : > { %v511_v14 = vsel %vm508_vm8, %v510_v8, %v506_v10  ;;  %v492_v15 = vsel %vm491_vm9, %v914_v58, %v488_v9  ;;  %631 = vmatpush.msra.mxu3 %v611_v13  ;;  %vm519_vm13 = vmor %vm517_vm12, %vm518_vm11 }
 0x2aa   : > { %v497_v16 = vsel %vm494_vm10, %v496_v11, %v492_v15  ;;  %v514_v17 = vsub.f32 1.0, %v513_v12  ;;  %v528_v18 = vmul.f32 %v904_v43, %v511_v14 }
 0x2ab   : > { %v527_v20 = vmul.f32 %v906_v45, %v497_v16  ;;  %v659_v45 = vld [vmem:[%s1281_s3 + $0x38] sm:$0xff] }
 0x2ac   : > { %v515_v21 = vmul.f32 %v916_v7, %v514_v17  ;;  %v559_v23 = vpop.permute.xlu0 %558  ;;  %532 = vst.msk [vmem:[%s1180_s12 + $0x10] sm:$0xff] %vm433_vm2, %v528_v18  ;;  %676 = vmatpush.msrb.mxu0 %v659_v45 }
 0x2ad   : > { %579 = vmatpush.msra.mxu1 %v559_v23  ;;  %531 = vst.msk [vmem:[%s1180_s12 + $0x8] sm:$0xff] %vm433_vm2, %v527_v20 }
 0x2ae   : > { %v516_v24 = vadd.f32 %v916_v7, %v515_v21  ;;  %837 = vmatmul.msk.f32.vlgmr.msra.gmra.mxu1 %vm433_vm2, %v527_v20  ;;  %677 = vmatpush.msrb.mxu0 %v658_v46 }
 0x2b0   : > { %v520_v26 = vsel %vm519_vm13, %v916_v7, %v516_v24  ;;  %v585_v27 = vpop.permute.xlu1 %584  ;;  %678 = vmatpush.msrb.mxu0 %v657_v47 }
 0x2b1   : > { %v525_v28 = vsel %vm522_vm14, %v524_v25, %v520_v26  ;;  %605 = vmatpush.msra.mxu2 %v585_v27 }
 0x2b2   : > { %838 = vmatmul.msk.f32.vlgmr.msra.gmra.mxu2 %vm433_vm2, %v528_v18  ;;  %v529_v29 = vmul.f32 %v1165_v48, %v525_v28  ;;  %v656_v48 = vld [vmem:[%s1281_s3 + $0x20] sm:$0xff] }
 0x2b3   : > { %679 = vmatpush.msrb.mxu0 %v656_v48 }
 0x2b4   : > { %839 = vmatmul.msk.f32.vlgmr.msra.gmra.mxu3 %vm433_vm2, %v529_v29  ;;  %533 = vst.msk [vmem:[%s1180_s12 + $0x18] sm:$0xff] %vm433_vm2, %v529_v29 }
 0x2b5   : > { %680 = vmatpush.msrb.mxu0 %v655_v49 }
 0x2b7   : > { %681 = vmatpush.msrb.mxu0 %v654_v50 }
 0x2b9   : > { %682 = vmatpush.msrb.mxu0 %v653_v51 }
 0x2bb   : > { %683 = vmatpush.msrb.mxu0 %v652_v52 }
 0x2db   : > { %v460_v30 = vpop.xlane.xlu1 %459 }
 0x2dc   : > { %917 = vrcp.f32 %v460_v30  ;;  %v481_v34 = vand.u32 2147483648, %v460_v30  ;;  %v479_v36 = vand.u32 2147483647, %v460_v30  ;;  %vm475_vm3 = vweird.f32 %v460_v30 }
 0x2de   : > { %v482_v38 = vor.u32 1.1754944e-38, %v481_v34  ;;  %vm480_vm5 = vcmp.eq.f32.partialorder %v479_v36, 8.507059e+37 }
 0x2e2   : > { %v918_v31 = vpop.eup %917 }
 0x2e3   : > { %v471_v32 = vmul.f32 %v918_v31, %v460_v30  ;;  %vm476_vm15 = vweird.f32 %v918_v31 }
 0x2e4   : > { %vm477_vm4 = vmor %vm475_vm3, %vm476_vm15 }
 0x2e5   : > { %v472_v33 = vsub.f32 1.0, %v471_v32 }
 0x2e7   : > { %v473_v35 = vmul.f32 %v918_v31, %v472_v33 }
 0x2e9   : > { %v474_v37 = vadd.f32 %v918_v31, %v473_v35 }
 0x2eb   : > { %v478_v39 = vsel %vm477_vm4, %v918_v31, %v474_v37 }
 0x2ec   : > { %v483_v40 = vsel %vm480_vm5, %v482_v38, %v478_v39 }
 0x2ed   : > { %v526_v41 = vmul.f32 %v1172_v53, %v483_v40 }
 0x2ef   : > { %836 = vmatmul.msk.f32.vlgmr.msra.gmra.mxu0 %vm433_vm2, %v526_v41  ;;  %530 = vst.msk [vmem:[%s1180_s12] sm:$0xff] %vm433_vm2, %v526_v41  ;;  %vm650_vm2 = vcmask 392192   ;;  %s939_s12 = scalar_lea.hbm %s1284_s6, 64 }
 0x32b   : > { %v581_v42 = vpop.f32.mrf.mxu1 }
 0x32c   : > { %637 = vrot.lane.b32.xlu0 %v581_v42, %s1015_s9 }
 0x335   : > { %v607_v43 = vpop.f32.mrf.mxu2 }
 0x336   : > { %641 = vrot.lane.b32.xlu2 %v607_v43, %s1019_s13  ;;  %s723_s13 = sshll.u32 %s720_s26, 4  ;;  %s724_s13 = int_to_ptr.hbm [resolvable:$true] %s723_s13 }
 0x337   : > { %v633_v44 = vpop.f32.mrf.mxu3  ;;  %s933_s28 = sshra.s32 %s724_s13, 4  ;;  %s934_s28 = int_to_ptr.hbm [resolvable:$true] %s933_s28 }
 0x338   : > { %645 = vrot.lane.b32.xlu0 %v633_v44, %s1020_s14  ;;  %s695_s14 = scalar_lea.sflag [#allocation5], %s1177_s10  ;;  %s935_s29 = scalar_lea.hbm %s934_s28, 32 }
 0x339   : > { %p936_p11 = scmp.ne.s32.totalorder %s934_s28, %s935_s29  ;;  %p940_p0 = scmp.lt.s32.totalorder %s934_s28, %s1284_s6 }
 0x33a   : > { %p941_p1 = scmp.lt.s32.totalorder %s939_s12, %s935_s29 }
 0x33b   : > { %p937_p12 = pnand %p936_p11, %p1097_p5 }
 0x33c   : > { %p942_p2 = por %p941_p1, %p940_p0 }
 0x33d   : > { %p938_p13 = pneg %p937_p12 }
 0x33f   : > { %p943_p3 = pnand %p942_p2, %p938_p13 }
 0x36c   : > { %v554_v54 = vpop.f32.mrf.mxu0 }
 0x390   : > { %v642_v56 = vpop.permute.xlu2 %641 }
 0x39e   : > { %v638_v53 = vpop.permute.xlu0 %637 }
 0x39f   : > { %v648_v55 = vsel %vm320_vm1, %v554_v54, %v638_v53 }
 0x3a0   : > { %v649_v57 = vsel %vm273_vm0, %v648_v55, %v642_v56 }
 0x3aa   : > { %v646_v58 = vpop.permute.xlu0 %645 }
 0x3ab   : > { %v651_v59 = vsel %vm650_vm2, %v649_v57, %v646_v58 }
 0x3ac   : > { %840 = vmatmul.msk.f32.vlgmr.msrb.gmra.mxu0 %vm664_vm6, %v651_v59 }
 0x3ad   : > { %946 = shalt.err (!%p943_p3)
}
 0x3ae   : > { %s1022_s19 = smov 128   ;;  %s1023_s20 = smov 8   ;;  %v902_v60 = vld [vmem:[%s1282_s4] ss:$0 sm:$0xff] }
 0x3af   : > { %850 = dma.vmem_to_hbm [thread:$0]  (%p1097_p5), %s722_s18, 512, %s724_s13, %s695_s14, %s1022_s19, %s1022_s19, %s1023_s20  }
 0x3b0   : > { %s823_s9 = sshll.u32 %s1177_s10, 3  ;;  %s843_s26 = sshll.u32 %s1080_s25, 3 }
 0x3b1   : > { %s705_s16 = scalar_lea.hbm %s1283_s5, %s843_s26  ;;  %s246_s12 = scalar_lea.vmem [#allocation2], %s823_s9 }
 0x3b2   : > { %s707_s17 = sshll.u32 %s246_s12, 4  ;;  %s709_s0 = sshll.u32 %s705_s16, 4  ;;  %s708_s17 = int_to_ptr.vmem [resolvable:$true] %s707_s17  ;;  %s710_s0 = int_to_ptr.hbm [resolvable:$true] %s709_s0 }
 0x3b3   : > { %s690_s18 = scalar_lea.sflag [#allocation3], %s1177_s10  ;;  %s961_s25 = sshra.s32 %s710_s0, 4  ;;  %s962_s25 = int_to_ptr.hbm [resolvable:$true] %s961_s25 }
 0x3b4   : > { %s963_s13 = scalar_lea.hbm %s962_s25, 8  ;;  %s967_s20 = scalar_lea.hbm %s1283_s5, 16 }
 0x3b5   : > { %p964_p4 = scmp.ne.s32.totalorder %s962_s25, %s963_s13  ;;  %p968_p9 = scmp.lt.s32.totalorder %s962_s25, %s1283_s5 }
 0x3b6   : > { %p969_p10 = scmp.lt.s32.totalorder %s967_s20, %s963_s13 }
 0x3b7   : > { %p965_p7 = pnand %p964_p4, %p1097_p5 }
 0x3b8   : > { %p970_p11 = por %p969_p10, %p968_p9 }
 0x3b9   : > { %p966_p8 = pneg %p965_p7 }
 0x3bb   : > { %p971_p12 = pnand %p970_p11, %p966_p8 }
 0x429   : > { %v685_v61 = vpop.f32.mrf.mxu0 }
 0x42a   : > { %v686_v62 = vadd.f32 %v902_v60, %v685_v61 }
 0x42c   : > { %688 = vst.msk [vmem:[%s246_s12] sm:$0xff] %vm273_vm0, %v686_v62 }
 0x42d   : > { %974 = shalt.err (!%p971_p12)
}
 0x42e   : > { %849 = dma.vmem_to_hbm [thread:$0]  (%p1097_p5), %s708_s17, 128, %s710_s0, %s690_s18  }
 0x42f PF: > { %p860_p13 = scmp.ge.s32.totalorder %s1013_s24, 2  ;;  %s738_s10 = sand.u32 1, %s1001_s21  }
 0x430   : > { %s739_s11 = scalar_lea.sflag [#allocation3], %s738_s10 }
 0x431   : > { %p854_p0 = pnand %p860_p13, %p1101_p6 }
 0x433   : > { %p855_p1 = pneg %p854_p0 }
 0x435   : > { %992 = dma.done.wait (%p855_p1), %s739_s11, 128  }
 0x436   : > { %994 = vsyncadd (%p855_p1), %s739_s11, 4294967168  ;;  %s749_s15 = scalar_lea.sflag [#allocation5], %s738_s10 }
 0x437   : > { %996 = dma.done.wait (%p855_p1), %s749_s15, 512  }
 0x438   : > { %998 = vsyncadd (%p855_p1), %s749_s15, 4294966784  ;;  %p20_p5 = scmp.ge.s32.totalorder %s1084_s27, 4   ;;  %s1289_s21 = smov %s1005_s22 }
 0x439   : > { %s1290_s22 = smov %s1009_s23  ;;  %s1291_s23 = smov %s1095_s30 }
 0x43a   : > { %s1292_s24 = smov %s1084_s27  ;;  %22 = sbr.rel (!%p20_p5) target bundleno = 7 (0x7), region = 92 }
 0x43f   :  { %755 = vsyncpa [#allocation3], 1 }
 0x440   :  { %757 = vsyncpa [#allocation3 + $0x1], 1 }
 0x441   :  { %758 = vsyncpa [#allocation5], 1 }
 0x442   :  { %760 = vsyncpa [#allocation5 + $0x1], 1 }

</bundles_post_ra>
